<compile_context>
chip_gen: v5e
topology: v5e:2x2
jax: 0.10.0
libtpu: 0.0.40
codegen_flags: <defaults>
</compile_context>

<pallas_src>
import functools

import jax
import jax.numpy as jnp
from jax import lax
from jax.experimental import pallas as pl
from jax.experimental.pallas import tpu as pltpu


# ----------------------------------------------------------------------------
# Pallas kernel: per-output-pixel homography transform + separable bilinear
# tent weights, MXU contraction over the long axis, VPU reduce over the short.
# ----------------------------------------------------------------------------
def _homography_sample_kernel(h_ref, img_ref, out_ref, *, h, w, contract_w,
                              k_dim, r_pad, bc_tile, tn):
    # ---- output-pixel indices for this q tile (lanes) ------------------------
    j = pl.program_id(1)
    q = j * tn + lax.broadcasted_iota(jnp.int32, (1, tn), 1)            # (1, tn)
    if (w & (w - 1)) == 0:                                              # w power of two
        shift = w.bit_length() - 1
        r_i = q >> shift
        c_i = q & (w - 1)
    else:
        r_i = q // w
        c_i = q - r_i * w
    r = r_i.astype(jnp.float32)
    c = c_i.astype(jnp.float32)

    # torch.linspace(-1, 1, n)[k] = -1 + 2*k/(n-1)
    x_n = c * (2.0 / max(w - 1, 1)) - 1.0
    y_n = r * (2.0 / max(h - 1, 1)) - 1.0

    # ---- homography + perspective divide (EUP reciprocal + Newton step) ------
    H00, H01, H02 = h_ref[0], h_ref[1], h_ref[2]
    H10, H11, H12 = h_ref[3], h_ref[4], h_ref[5]
    H20, H21, H22 = h_ref[6], h_ref[7], h_ref[8]
    X = H00 * x_n + H01 * y_n + H02
    Y = H10 * x_n + H11 * y_n + H12
    Z = H20 * x_n + H21 * y_n + H22
    inv_z = pl.reciprocal(Z, approx=True)          # EUP slot (off the VALU)
    inv_z = inv_z * (2.0 - Z * inv_z)              # one Newton step -> ~f32 accuracy
    x_t = X * inv_z
    y_t = Y * inv_z

    # ---- grid_sample unnormalization (bilinear, zeros, align_corners=False) --
    ix = ((x_t + 1.0) * w - 1.0) * 0.5             # continuous source column
    iy = ((y_t + 1.0) * h - 1.0) * 0.5             # continuous source row

    # MXU-contracted ("K") coordinate vs VPU-reduced ("R") coordinate.
    k_coord = ix if contract_w else iy             # (1, tn)
    r_coord = iy if contract_w else ix             # (1, tn)

    # ---- separable tent weights (zero outside the image by construction) -----
    k_iota = lax.broadcasted_iota(jnp.int32, (k_dim, tn), 0).astype(jnp.float32)
    r_iota = lax.broadcasted_iota(jnp.int32, (r_pad, tn), 0).astype(jnp.float32)
    wk = jnp.maximum(1.0 - jnp.abs(k_iota - k_coord), 0.0)              # (k_dim, tn)
    wr = jnp.maximum(1.0 - jnp.abs(r_iota - r_coord), 0.0)              # (r_pad, tn)

    # ---- MXU contraction over the K axis --------------------------------------
    # img_ref rows are laid out as bc*r_pad + r, columns are k.
    s = jnp.dot(img_ref[...], wk.astype(img_ref.dtype),
                preferred_element_type=jnp.float32)                     # (bc_tile*r_pad, tn)

    # ---- VPU reduce over the R axis: fused multiply + sublane reduce ----------
    # Padded R rows of the image are zero, so their (arbitrary) wr values contribute 0.
    out_ref[...] = (s.reshape(bc_tile, r_pad, tn) * wr[None, :, :]).sum(axis=1)


# ----------------------------------------------------------------------------
# Glue (plain JAX): basis, truncated "matrix exponential", tiling, wrapper.
# ----------------------------------------------------------------------------
def make_basis():
    b = jnp.zeros((8, 3, 3), dtype=jnp.float32)
    b = b.at[0, 0, 2].set(1.0)
    b = b.at[1, 1, 2].set(1.0)
    b = b.at[2, 0, 1].set(1.0)
    b = b.at[3, 1, 0].set(1.0)
    b = b.at[4, 0, 0].set(1.0)
    b = b.at[4, 1, 1].set(-1.0)
    b = b.at[5, 1, 1].set(-1.0)
    b = b.at[5, 2, 2].set(1.0)
    b = b.at[6, 2, 0].set(1.0)
    b = b.at[7, 2, 1].set(1.0)
    return b


def mexp(basis, v):
    """Exact replica of Homography.Mexp.

    NOTE: intentionally replicates the module's non-standard factorial accumulation
    (A is divided by a *running product* each iteration), so this is NOT a true
    matrix exponential — kept for parity with the reference.
    """
    G = jnp.sum(v * basis, axis=0)
    A = jnp.eye(3, dtype=jnp.float32)
    Hm = jnp.eye(3, dtype=jnp.float32)
    n_fact = 1
    for i in range(11):
        A = G @ A
        n_fact = max(i, 1) * n_fact
        A = A / n_fact
        Hm = Hm + A
    return Hm / Hm[2, 2]


def _vmem_capacity_bytes():
    try:
        return int(pltpu.get_tpu_info().vmem_capacity_bytes)
    except Exception:
        return 64 * 1024 * 1024        # conservative fallback (v7x per-TensorCore)


def _select_tiling(BC, Rp, K, HW, itemsize, vmem_cap):
    """Pick (bc_tile, BCp, tn, HWp, vmem_limit) under a VMEM working-set budget."""
    budget = min(int(0.55 * vmem_cap), 96 * 1024 * 1024)

    def est(bc_tile, tn):
        img_blk = 2 * bc_tile * Rp * K * itemsize        # double-buffered input block
        out_blk = 2 * bc_tile * tn * 4                   # double-buffered output block
        s_tmp = 2 * bc_tile * Rp * tn * 4                # matmul result + weighted copy
        w_tmp = (K + Rp) * tn * (4 + itemsize)           # tent weights (+ cast copy)
        misc = 64 * tn * 4
        return img_blk + out_blk + s_tmp + w_tmp + misc

    # ---- batch*channel tile ------------------------------------------------
    if est(BC, 128) <= budget:
        bc_tile, BCp = BC, BC                            # whole batch resident, no BC pad
    else:
        bc_tile = 8
        for cand in range(8 * (BC // 8), 7, -8):
            if est(cand, 128) <= budget:
                bc_tile = cand
                break
        BCp = ((BC + bc_tile - 1) // bc_tile) * bc_tile

    # ---- q tile: lane-dense, as large as the budget allows ------------------
    hw128 = ((HW + 127) // 128) * 128
    tn = 128
    for cand in (2048, 1024, 512, 256, 128):
        if cand <= hw128 and est(bc_tile, cand) <= budget:
            tn = cand
            break
    HWp = ((HW + tn - 1) // tn) * tn

    vmem_limit = int(min(0.9 * vmem_cap, max(32 * 1024 * 1024, 2 * est(bc_tile, tn))))
    return bc_tile, BCp, tn, HWp, vmem_limit


def homography_forward(I, v, basis, *, mxu_dtype=jnp.bfloat16):
    """I: (B, C, H, W) float32  ->  (J: (B, C, H, W) float32, Hm: (3, 3))."""
    B, C, h, w = I.shape
    Hm = mexp(basis, v)

    BC = B * C
    HW = h * w

    # Contract the longer spatial axis on the MXU (fills the systolic K depth);
    # reduce the shorter one on the VPU.
    contract_w = w >= h
    K = w if contract_w else h
    R = h if contract_w else w
    Rp = ((R + 7) // 8) * 8                              # sublane-aligned reduced axis

    itemsize = jnp.dtype(mxu_dtype).itemsize
    bc_tile, BCp, tn, HWp, vmem_limit = _select_tiling(
        BC, Rp, K, HW, itemsize, _vmem_capacity_bytes())

    # Image layout: (BC, R, K); transpose if contracting over y; zero-pad R and BC.
    img = I.reshape(BC, h, w).astype(jnp.float32)
    if not contract_w:
        img = jnp.transpose(img, (0, 2, 1))              # rows = x (R), cols = y (K)
    if BCp != BC or Rp != R:
        img = jnp.pad(img, ((0, BCp - BC), (0, Rp - R), (0, 0)))
    img2 = img.reshape(BCp * Rp, K).astype(mxu_dtype)    # row index = bc*Rp + r

    kernel = functools.partial(
        _homography_sample_kernel,
        h=h, w=w, contract_w=contract_w,
        k_dim=K, r_pad=Rp, bc_tile=bc_tile, tn=tn)

    grid = (BCp // bc_tile, HWp // tn)

    out = pl.pallas_call(
        kernel,
        out_shape=jax.ShapeDtypeStruct((BCp, HWp), jnp.float32),
        grid_spec=pltpu.PrefetchScalarGridSpec(
            num_scalar_prefetch=0,
            grid=grid,
            in_specs=[
                # Flattened homography (9,) -> SMEM scalars.
                pl.BlockSpec(memory_space=pltpu.MemorySpace.SMEM),
                # One BC block of the image, resident across all q tiles of that block.
                pl.BlockSpec((bc_tile * Rp, K), lambda b, j: (b, 0)),
            ],
            out_specs=pl.BlockSpec((bc_tile, tn), lambda b, j: (b, j)),
        ),
        compiler_params=pltpu.CompilerParams(
            dimension_semantics=("parallel", "parallel"),
            vmem_limit_bytes=vmem_limit,
        ),
    )(Hm.reshape(9).astype(jnp.float32), img2)

    J = out
    if HWp != HW:
        J = J[:, :HW]
    if BCp != BC:
        J = J[:BC]
    return J.reshape(B, C, h, w), Hm


# ----------------------------------------------------------------------------
# Pure-JAX reference (explicit gather grid_sample) for validation.
# ----------------------------------------------------------------------------
def reference_forward(I, v, basis):
    B, C, h, w = I.shape
    Hm = mexp(basis, v)
    x = jnp.linspace(-1.0, 1.0, w)
    y = jnp.linspace(-1.0, 1.0, h)
    xx, yy = jnp.meshgrid(x, y)                          # indexing='xy' -> (h, w)
    grid = jnp.stack([xx, yy], -1).reshape(-1, 2).T      # (2, HW)
    ones = jnp.ones((1, grid.shape[1]), dtype=jnp.float32)
    gt = Hm @ jnp.concatenate([grid, ones], axis=0)
    gt = gt / gt[2:, :]
    x_t, y_t = gt[0], gt[1]

    ix = ((x_t + 1.0) * w - 1.0) * 0.5
    iy = ((y_t + 1.0) * h - 1.0) * 0.5
    ix0 = jnp.floor(ix).astype(jnp.int32)
    iy0 = jnp.floor(iy).astype(jnp.int32)
    ix1, iy1 = ix0 + 1, iy0 + 1
    wx1 = ix - ix0
    wx0 = 1.0 - wx1
    wy1 = iy - iy0
    wy0 = 1.0 - wy1

    img = I.reshape(B * C, h * w)

    def gather(iy_c, ix_c, wgt):
        valid = (ix_c >= 0) & (ix_c < w) & (iy_c >= 0) & (iy_c < h)
        idx = jnp.clip(iy_c, 0, h - 1) * w + jnp.clip(ix_c, 0, w - 1)
        vals = img[:, idx]
        return vals * jnp.where(valid, wgt, 0.0)[None, :]

    J = (gather(iy0, ix0, wy0 * wx0) + gather(iy0, ix1, wy0 * wx1)
         + gather(iy1, ix0, wy1 * wx0) + gather(iy1, ix1, wy1 * wx1))
    return J.reshape(B, C, h, w), Hm


if __name__ == "__main__":
    key = jax.random.PRNGKey(0)
    B, C, H, W = 2, 4, 16, 16
    I = jax.random.normal(key, (B, C, H, W), dtype=jnp.float32)

    basis = make_basis()
    # Parameter init exactly as in __init__: v = zeros((8,1,1)) * 0.1 == zeros.
    v = jnp.zeros((8, 1, 1), dtype=jnp.float32)

    # Default (bf16 MXU feed) path — relaxed tolerance for bf16 rounding.
    J, Hm = homography_forward(I, v, basis)
    jax.block_until_ready((J, Hm))
    J_ref, Hm_ref = reference_forward(I, v, basis)
    assert jnp.allclose(Hm, Hm_ref, atol=1e-5)
    assert jnp.allclose(J, J_ref, atol=5e-2, rtol=2e-2), float(jnp.max(jnp.abs(J - J_ref)))

    # f32 MXU path — tight check of the kernel structure.
    J32, _ = homography_forward(I, v, basis, mxu_dtype=jnp.float32)
    jax.block_until_ready(J32)
    assert jnp.allclose(J32, J_ref, atol=1e-3), float(jnp.max(jnp.abs(J32 - J_ref)))

    # Non-trivial homography to exercise the full transform + divide path.
    v2 = 0.03 * jnp.arange(1, 9, dtype=jnp.float32).reshape(8, 1, 1)
    J2, Hm2 = homography_forward(I, v2, basis)
    J2_ref, Hm2_ref = reference_forward(I, v2, basis)
    jax.block_until_ready(J2)
    assert jnp.allclose(Hm2, Hm2_ref, atol=1e-5)
    assert jnp.allclose(J2, J2_ref, atol=5e-2, rtol=2e-2), float(jnp.max(jnp.abs(J2 - J2_ref)))
    J2_32, _ = homography_forward(I, v2, basis, mxu_dtype=jnp.float32)
    jax.block_until_ready(J2_32)
    assert jnp.allclose(J2_32, J2_ref, atol=1e-3), float(jnp.max(jnp.abs(J2_32 - J2_ref)))

    # Non-square image with HW not a multiple of 256: exercises the transposed
    # (contract-over-y) layout and the padded q axis.
    I3 = jax.random.normal(jax.random.PRNGKey(1), (1, 2, 24, 16), dtype=jnp.float32)
    J3, _ = homography_forward(I3, v2, basis, mxu_dtype=jnp.float32)
    jax.block_until_ready(J3)
    J3_ref, _ = reference_forward(I3, v2, basis)
    assert jnp.allclose(J3, J3_ref, atol=1e-3), float(jnp.max(jnp.abs(J3 - J3_ref)))

    print("KERNEL_OK")
</pallas_src>

<mosaic_0001>
module attributes {stable_mosaic.version = 11 : i64} {
  func.func @_homography_sample_kernel(%arg0: i32, %arg1: i32, %arg2: memref<9xf32, #tpu.memory_space<smem>>, %arg3: memref<128x16xbf16, #tpu.memory_space<vmem>>, %arg4: memref<8x256xf32, #tpu.memory_space<vmem>>) attributes {dimension_semantics = [#tpu.dimension_semantics<parallel>, #tpu.dimension_semantics<parallel>], iteration_bounds = array<i64: 1, 1>, scalar_prefetch = 0 : i64, scratch_operands = 0 : i64, tpu.core_type = #tpu.core_type<tc>, window_params = [{transform_indices = @transform_0, window_bounds = array<i64: 9>}, {transform_indices = @transform_1, window_bounds = array<i64: 128, 16>}, {transform_indices = @transform_2, window_bounds = array<i64: 8, 256>}]} {
    %c256_i32 = arith.constant 256 : i32
    %0 = arith.muli %arg1, %c256_i32 : i32
    %1 = tpu.iota {dimensions = array<i32: 1>} : vector<1x256xi32>
    %2 = vector.broadcast %0 : i32 to vector<1x256xi32>
    %3 = arith.addi %2, %1 : vector<1x256xi32>
    %c4_i32 = arith.constant 4 : i32
    %4 = vector.broadcast %c4_i32 : i32 to vector<1x256xi32>
    %5 = arith.shrsi %3, %4 : vector<1x256xi32>
    %c15_i32 = arith.constant 15 : i32
    %6 = vector.broadcast %c15_i32 : i32 to vector<1x256xi32>
    %7 = arith.andi %3, %6 : vector<1x256xi32>
    %8 = arith.sitofp %5 : vector<1x256xi32> to vector<1x256xf32>
    %9 = arith.sitofp %7 : vector<1x256xi32> to vector<1x256xf32>
    %cst = arith.constant 0.13333334 : f32
    %10 = vector.broadcast %cst : f32 to vector<1x256xf32>
    %11 = arith.mulf %9, %10 : vector<1x256xf32>
    %cst_0 = arith.constant 1.000000e+00 : f32
    %12 = vector.broadcast %cst_0 : f32 to vector<1x256xf32>
    %13 = arith.subf %11, %12 : vector<1x256xf32>
    %cst_1 = arith.constant 0.13333334 : f32
    %14 = vector.broadcast %cst_1 : f32 to vector<1x256xf32>
    %15 = arith.mulf %8, %14 : vector<1x256xf32>
    %cst_2 = arith.constant 1.000000e+00 : f32
    %16 = vector.broadcast %cst_2 : f32 to vector<1x256xf32>
    %17 = arith.subf %15, %16 : vector<1x256xf32>
    %c0 = arith.constant 0 : index
    %18 = memref.load %arg2[%c0] : memref<9xf32, #tpu.memory_space<smem>>
    %c1 = arith.constant 1 : index
    %19 = memref.load %arg2[%c1] : memref<9xf32, #tpu.memory_space<smem>>
    %c2 = arith.constant 2 : index
    %20 = memref.load %arg2[%c2] : memref<9xf32, #tpu.memory_space<smem>>
    %c3 = arith.constant 3 : index
    %21 = memref.load %arg2[%c3] : memref<9xf32, #tpu.memory_space<smem>>
    %c4 = arith.constant 4 : index
    %22 = memref.load %arg2[%c4] : memref<9xf32, #tpu.memory_space<smem>>
    %c5 = arith.constant 5 : index
    %23 = memref.load %arg2[%c5] : memref<9xf32, #tpu.memory_space<smem>>
    %c6 = arith.constant 6 : index
    %24 = memref.load %arg2[%c6] : memref<9xf32, #tpu.memory_space<smem>>
    %c7 = arith.constant 7 : index
    %25 = memref.load %arg2[%c7] : memref<9xf32, #tpu.memory_space<smem>>
    %c8 = arith.constant 8 : index
    %26 = memref.load %arg2[%c8] : memref<9xf32, #tpu.memory_space<smem>>
    %27 = vector.broadcast %18 : f32 to vector<1x256xf32>
    %28 = arith.mulf %27, %13 : vector<1x256xf32>
    %29 = vector.broadcast %19 : f32 to vector<1x256xf32>
    %30 = arith.mulf %29, %17 : vector<1x256xf32>
    %31 = arith.addf %28, %30 : vector<1x256xf32>
    %32 = vector.broadcast %20 : f32 to vector<1x256xf32>
    %33 = arith.addf %31, %32 : vector<1x256xf32>
    %34 = vector.broadcast %21 : f32 to vector<1x256xf32>
    %35 = arith.mulf %34, %13 : vector<1x256xf32>
    %36 = vector.broadcast %22 : f32 to vector<1x256xf32>
    %37 = arith.mulf %36, %17 : vector<1x256xf32>
    %38 = arith.addf %35, %37 : vector<1x256xf32>
    %39 = vector.broadcast %23 : f32 to vector<1x256xf32>
    %40 = arith.addf %38, %39 : vector<1x256xf32>
    %41 = vector.broadcast %24 : f32 to vector<1x256xf32>
    %42 = arith.mulf %41, %13 : vector<1x256xf32>
    %43 = vector.broadcast %25 : f32 to vector<1x256xf32>
    %44 = arith.mulf %43, %17 : vector<1x256xf32>
    %45 = arith.addf %42, %44 : vector<1x256xf32>
    %46 = vector.broadcast %26 : f32 to vector<1x256xf32>
    %47 = arith.addf %45, %46 : vector<1x256xf32>
    %48 = tpu.reciprocal %47 {approx = true} : vector<1x256xf32> -> vector<1x256xf32>
    %49 = arith.mulf %47, %48 : vector<1x256xf32>
    %cst_3 = arith.constant 2.000000e+00 : f32
    %50 = vector.broadcast %cst_3 : f32 to vector<1x256xf32>
    %51 = arith.subf %50, %49 : vector<1x256xf32>
    %52 = arith.mulf %48, %51 : vector<1x256xf32>
    %53 = arith.mulf %33, %52 : vector<1x256xf32>
    %54 = arith.mulf %40, %52 : vector<1x256xf32>
    %cst_4 = arith.constant 1.000000e+00 : f32
    %55 = vector.broadcast %cst_4 : f32 to vector<1x256xf32>
    %56 = arith.addf %53, %55 : vector<1x256xf32>
    %cst_5 = arith.constant 1.600000e+01 : f32
    %57 = vector.broadcast %cst_5 : f32 to vector<1x256xf32>
    %58 = arith.mulf %56, %57 : vector<1x256xf32>
    %cst_6 = arith.constant 1.000000e+00 : f32
    %59 = vector.broadcast %cst_6 : f32 to vector<1x256xf32>
    %60 = arith.subf %58, %59 : vector<1x256xf32>
    %cst_7 = arith.constant 5.000000e-01 : f32
    %61 = vector.broadcast %cst_7 : f32 to vector<1x256xf32>
    %62 = arith.mulf %60, %61 : vector<1x256xf32>
    %cst_8 = arith.constant 1.000000e+00 : f32
    %63 = vector.broadcast %cst_8 : f32 to vector<1x256xf32>
    %64 = arith.addf %54, %63 : vector<1x256xf32>
    %cst_9 = arith.constant 1.600000e+01 : f32
    %65 = vector.broadcast %cst_9 : f32 to vector<1x256xf32>
    %66 = arith.mulf %64, %65 : vector<1x256xf32>
    %cst_10 = arith.constant 1.000000e+00 : f32
    %67 = vector.broadcast %cst_10 : f32 to vector<1x256xf32>
    %68 = arith.subf %66, %67 : vector<1x256xf32>
    %cst_11 = arith.constant 5.000000e-01 : f32
    %69 = vector.broadcast %cst_11 : f32 to vector<1x256xf32>
    %70 = arith.mulf %68, %69 : vector<1x256xf32>
    %71 = tpu.iota {dimensions = array<i32: 0>} : vector<16x256xi32>
    %72 = arith.sitofp %71 : vector<16x256xi32> to vector<16x256xf32>
    %73 = tpu.iota {dimensions = array<i32: 0>} : vector<16x256xi32>
    %74 = arith.sitofp %73 : vector<16x256xi32> to vector<16x256xf32>
    %75 = vector.broadcast %62 : vector<1x256xf32> to vector<16x256xf32>
    %76 = arith.subf %72, %75 : vector<16x256xf32>
    %77 = math.absf %76 : vector<16x256xf32>
    %cst_12 = arith.constant 1.000000e+00 : f32
    %78 = vector.broadcast %cst_12 : f32 to vector<16x256xf32>
    %79 = arith.subf %78, %77 : vector<16x256xf32>
    %cst_13 = arith.constant 0.000000e+00 : f32
    %80 = vector.broadcast %cst_13 : f32 to vector<16x256xf32>
    %81 = arith.maximumf %79, %80 : vector<16x256xf32>
    %82 = vector.broadcast %70 : vector<1x256xf32> to vector<16x256xf32>
    %83 = arith.subf %74, %82 : vector<16x256xf32>
    %84 = math.absf %83 : vector<16x256xf32>
    %cst_14 = arith.constant 1.000000e+00 : f32
    %85 = vector.broadcast %cst_14 : f32 to vector<16x256xf32>
    %86 = arith.subf %85, %84 : vector<16x256xf32>
    %cst_15 = arith.constant 0.000000e+00 : f32
    %87 = vector.broadcast %cst_15 : f32 to vector<16x256xf32>
    %88 = arith.maximumf %86, %87 : vector<16x256xf32>
    %c0_16 = arith.constant 0 : index
    %c0_17 = arith.constant 0 : index
    %89 = vector.load %arg3[%c0_16, %c0_17] : memref<128x16xbf16, #tpu.memory_space<vmem>>, vector<128x16xbf16>
    %90 = arith.truncf %81 : vector<16x256xf32> to vector<16x256xbf16>
    %cst_18 = arith.constant dense<0.000000e+00> : vector<128x256xf32>
    %91 = tpu.matmul %89, %90, %cst_18 {dimension_numbers = #tpu.dot_dimension_numbers<[1], [0], [0], [1], [0, 0, 1, 1], [], []>} : vector<128x16xbf16>, vector<16x256xbf16>, vector<128x256xf32> -> vector<128x256xf32>
    %92 = vector.shape_cast %91 : vector<128x256xf32> to vector<8x16x256xf32>
    %93 = vector.shape_cast %88 : vector<16x256xf32> to vector<1x16x256xf32>
    %94 = vector.broadcast %93 : vector<1x16x256xf32> to vector<8x16x256xf32>
    %95 = arith.mulf %92, %94 : vector<8x16x256xf32>
    %cst_19 = arith.constant dense<0.000000e+00> : vector<8x256xf32>
    %96 = vector.multi_reduction <add>, %95, %cst_19 [1] : vector<8x16x256xf32> to vector<8x256xf32>
    %c0_20 = arith.constant 0 : index
    %c0_21 = arith.constant 0 : index
    %97 = vector.load %arg4[%c0_20, %c0_21] : memref<8x256xf32, #tpu.memory_space<vmem>>, vector<8x256xf32>
    tpu.vector_store %arg4[%c0_20, %c0_21], %96 {strides = array<i32>} : memref<8x256xf32, #tpu.memory_space<vmem>>, vector<8x256xf32>,
    return
  }
  func.func @transform_0(%arg0: i32, %arg1: i32) -> i32 {
    %c0_i32 = arith.constant 0 : i32
    %c0_i32_0 = arith.constant 0 : i32
    return %c0_i32 : i32
  }
  func.func @transform_1(%arg0: i32, %arg1: i32) -> (i32, i32) {
    %c0_i32 = arith.constant 0 : i32
    %c0_i32_0 = arith.constant 0 : i32
    return %arg0, %c0_i32 : i32, i32
  }
  func.func @transform_2(%arg0: i32, %arg1: i32) -> (i32, i32) {
    %c0_i32 = arith.constant 0 : i32
    return %arg0, %arg1 : i32, i32
  }
}

</mosaic_0001>

<bundles_post_ra>
// kernel: tpu_custom_call.1
= control target key start
LH: loop header
LB: loop body
LE: loop exit
PB: predicated region body
PF: predicated region fallthrough
CT: control target
= control target key end

     0   :  { %7 = vsyncpa [#allocation4], 0  ;;  %s815_s0 = inlined_call_operand.vmem [shape: f32[9], index: 0, kind: input, shape index: {}]   ;;  %s816_s1 = inlined_call_operand.vmem [shape: bf16[128,16], index: 1, kind: input, shape index: {}]   ;;  %s817_s2 = inlined_call_operand.hbm [shape: f32[8,256], index: 2, kind: output, shape index: {}]  }
   0x1   :  { %8 = vsyncpa [#allocation3], 0  ;;  %s14_s11 = sshll.u32 %s815_s0, 4  ;;  %s659_s12 = smov [#allocation2]   ;;  %s15_s11 = int_to_ptr.vmem [resolvable:$true] %s14_s11 }
   0x2   :  { %17 = dma.vmem_to_smem %s15_s11, 16, %s659_s12, [#allocation4]  }
   0x3   :  { %655 = dma.done.wait [#allocation4], 16  }
   0x4   :  { %656 = vsyncadd [#allocation4], 4294967280 }
   0x5   :  { %24 = sfence }
   0x6   :  { %v27_v0 = vlaneseq  ;;  %s680_s13 = sld [smem:[#allocation2 + $0x3]]  ;;  %vm214_vm0 = vcmask 130048   ;;  %vm497_vm1 = vcmask 1041409   ;;  %vm499_vm2 = vcmask 1042434   ;;  %s529_s12 = sshll.u32 %s817_s2, 4  ;;  %s530_s12 = int_to_ptr.hbm [resolvable:$true] %s529_s12 }
   0x7   :  { %s682_s14 = sld [smem:[#allocation2 + $0x4]]  ;;  %vm501_vm3 = vcmask 1043459   ;;  %vm503_vm4 = vcmask 1044484   ;;  %vm505_vm5 = vcmask 1045509   ;;  %vm507_vm6 = vcmask 1046534  }
   0x8   :  { %v28_v1 = vand.u32 127, %v27_v0  ;;  %s548_s0 = sld [smem:[#allocation2 + $0x6]]  ;;  %v120_v55 = vshrl.u32 %v27_v0, 7  ;;  %vm509_vm7 = vcmask 1047559  }
   0x9   :  { %s549_s15 = sld [smem:[#allocation2 + $0x7]] }
   0xa   :  { %v33_v2 = vshra.s32 %v28_v1, 4  ;;  %v35_v3 = vand.u32 15, %v28_v1  ;;  %v29_v4 = vadd.s32 128, %v28_v1  ;;  %s684_s16 = sld [smem:[#allocation2 + $0x8]]  ;;  %v121_v63 = vadd.s32 8, %v120_v55 }
   0xb   :  { %s686_s17 = sld [smem:[#allocation2]] }
   0xc   :  { %v37_v5 = vcvt.s32.f32 %v33_v2  ;;  %v39_v6 = vcvt.s32.f32 %v35_v3  ;;  %v34_v7 = vshra.s32 %v29_v4, 4  ;;  %v36_v8 = vand.u32 15, %v29_v4  ;;  %s689_s18 = sld [smem:[#allocation2 + $0x1]] }
   0xd   :  { %v69_v12 = vstv %s680_s13  ;;  %v72_v16 = vstv %s682_s14  ;;  %s544_s19 = sld [smem:[#allocation2 + $0x2]] }
   0xe   :  { %v41_v9 = vmul.f32 0.13333334, %v39_v6  ;;  %v45_v10 = vmul.f32 0.13333334, %v37_v5  ;;  %v38_v11 = vcvt.s32.f32 %v34_v7  ;;  %v40_v13 = vcvt.s32.f32 %v36_v8  ;;  %s547_s20 = sld [smem:[#allocation2 + $0x5]] }
   0xf   :  { %v80_v21 = vstv %s548_s0  ;;  %v83_v22 = vstv %s549_s15 }
  0x10   :  { %v539_v14 = vadd.f32 -1.0, %v41_v9  ;;  %v541_v15 = vadd.f32 -1.0, %v45_v10  ;;  %v46_v17 = vmul.f32 0.13333334, %v38_v11  ;;  %v42_v18 = vmul.f32 0.13333334, %v40_v13 }
  0x11   :  { %v88_v28 = vstv %s684_s16  ;;  %v58_v32 = vstv %s686_s17  ;;  %v696_v9 = vcvt.s32.f32 %v120_v55  ;;  %v698_v10 = vcvt.s32.f32 %v121_v63 }
  0x12   :  { %v70_v19 = vmul.f32 %v539_v14, %v69_v12  ;;  %v73_v20 = vmul.f32 %v541_v15, %v72_v16  ;;  %v540_v23 = vadd.f32 -1.0, %v42_v18  ;;  %v542_v24 = vadd.f32 -1.0, %v46_v17 }
  0x13   :  { %v81_v26 = vmul.f32 %v539_v14, %v80_v21  ;;  %v84_v27 = vmul.f32 %v541_v15, %v83_v22  ;;  %v61_v33 = vstv %s689_s18  ;;  %v59_v37 = vmul.f32 %v539_v14, %v58_v32 }
  0x14   :  { %v75_v25 = vadd.f32 %v73_v20, %v70_v19  ;;  %v82_v29 = vmul.f32 %v540_v23, %v80_v21  ;;  %v85_v31 = vmul.f32 %v542_v24, %v83_v22  ;;  %v62_v38 = vmul.f32 %v541_v15, %v61_v33 }
  0x15   :  { %v86_v30 = vadd.f32 %v84_v27, %v81_v26  ;;  %v71_v39 = vmul.f32 %v540_v23, %v69_v12  ;;  %v74_v40 = vmul.f32 %v542_v24, %v72_v16  ;;  %v60_v41 = vmul.f32 %v540_v23, %v58_v32 }
  0x16   :  { %v87_v35 = vadd.f32 %v85_v31, %v82_v29  ;;  %v63_v42 = vmul.f32 %v542_v24, %v61_v33  ;;  %v64_v44 = vadd.f32 %v62_v38, %v59_v37  ;;  %v66_v46 = vstv %s544_s19 }
  0x17   :  { %v89_v34 = vadd.f32 %v88_v28, %v86_v30  ;;  %v76_v43 = vadd.f32 %v74_v40, %v71_v39  ;;  %v77_v47 = vstv %s547_s20 }
  0x18   :  { %v90_v36 = vadd.f32 %v88_v28, %v87_v35  ;;  %v65_v49 = vadd.f32 %v63_v42, %v60_v41  ;;  %v67_v51 = vadd.f32 %v66_v46, %v64_v44  ;;  %v78_v52 = vadd.f32 %v77_v47, %v75_v25  ;;  %v603_v41 = vld [vmem:[%s816_s1] sm:$0xff]  ;;  %v604_v44 = vld [vmem:[%s816_s1 + $0x8] sm:$0xff] }
  0x19   :  { %615 = vrcp.f32 %v89_v34  ;;  %v79_v58 = vadd.f32 %v77_v47, %v76_v43  ;;  %v607_v42 = vld [vmem:[%s816_s1 + $0x20] sm:$0xff]  ;;  %v609_v47 = vld [vmem:[%s816_s1 + $0x30] sm:$0xff] }
  0x1a   :  { %617 = vrcp.f32 %v90_v36  ;;  %v68_v57 = vadd.f32 %v66_v46, %v65_v49  ;;  %v605_v46 = vld [vmem:[%s816_s1 + $0x10] sm:$0xff]  ;;  %v610_v49 = vld [vmem:[%s816_s1 + $0x38] sm:$0xff] }
  0x1f   :  { %v616_v45 = vpop.eup %615 }
  0x20   :  { %v93_v48 = vmul.f32 %v616_v45, %v89_v34  ;;  %v618_v50 = vpop.eup %617 }
  0x21   :  { %v94_v54 = vmul.f32 %v618_v50, %v90_v36 }
  0x22   :  { %v95_v53 = vsub.f32 2.0, %v93_v48  ;;  %v606_v48 = vld [vmem:[%s816_s1 + $0x18] sm:$0xff] }
  0x23   :  { %v96_v59 = vsub.f32 2.0, %v94_v54 }
  0x24   :  { %v97_v56 = vmul.f32 %v616_v45, %v95_v53  ;;  %v608_v45 = vld [vmem:[%s816_s1 + $0x28] sm:$0xff]  ;;  %s660_s1 = smov [#allocation5]  }
  0x25   :  { %v98_v62 = vmul.f32 %v618_v50, %v96_v59  ;;  %s527_s9 = sshll.u32 %s660_s1, 4  ;;  %s528_s9 = int_to_ptr.vmem [resolvable:$true] %s527_s9 }
  0x26   :  { %v99_v60 = vmul.f32 %v97_v56, %v67_v51  ;;  %v101_v61 = vmul.f32 %v97_v56, %v78_v52 }
  0x27   :  { %v100_v3 = vmul.f32 %v98_v62, %v68_v57  ;;  %v102_v4 = vmul.f32 %v98_v62, %v79_v58 }
  0x28   :  { %v103_v1 = vadd.f32 1.0, %v99_v60  ;;  %v111_v2 = vadd.f32 1.0, %v101_v61 }
  0x29   :  { %v104_v7 = vadd.f32 1.0, %v100_v3  ;;  %v112_v8 = vadd.f32 1.0, %v102_v4 }
  0x2a   :  { %v105_v5 = vmul.f32 16.0, %v103_v1  ;;  %v113_v6 = vmul.f32 16.0, %v111_v2 }
  0x2b   :  { %v106_v12 = vmul.f32 16.0, %v104_v7  ;;  %v114_v13 = vmul.f32 16.0, %v112_v8 }
  0x2c   :  { %v551_v0 = vadd.f32 -1.0, %v105_v5  ;;  %v553_v11 = vadd.f32 -1.0, %v113_v6 }
  0x2d   :  { %v552_v16 = vadd.f32 -1.0, %v106_v12  ;;  %v554_v17 = vadd.f32 -1.0, %v114_v13 }
  0x2e   :  { %v109_v14 = vmul.f32 0.5, %v551_v0  ;;  %v117_v15 = vmul.f32 0.5, %v553_v11 }
  0x2f   :  { %v110_v22 = vmul.f32 0.5, %v552_v16  ;;  %v118_v23 = vmul.f32 0.5, %v554_v17 }
  0x30   :  { %v124_v18 = vsub.f32 %v696_v9, %v109_v14  ;;  %v126_v19 = vsub.f32 %v698_v10, %v109_v14  ;;  %v140_v20 = vsub.f32 %v696_v9, %v117_v15  ;;  %v142_v21 = vsub.f32 %v698_v10, %v117_v15 }
  0x31   :  { %v125_v26 = vsub.f32 %v696_v9, %v110_v22  ;;  %v127_v27 = vsub.f32 %v698_v10, %v110_v22  ;;  %v141_v28 = vsub.f32 %v696_v9, %v118_v23  ;;  %v143_v31 = vsub.f32 %v698_v10, %v118_v23 }
  0x32   :  { %v128_v24 = vand.u32 2147483647, %v124_v18  ;;  %v130_v25 = vand.u32 2147483647, %v126_v19  ;;  %v144_v50 = vand.u32 2147483647, %v140_v20 }
  0x33   :  { %v129_v32 = vand.u32 2147483647, %v125_v26  ;;  %v131_v33 = vand.u32 2147483647, %v127_v27  ;;  %v146_v51 = vand.u32 2147483647, %v142_v21 }
  0x34   :  { %v132_v29 = vsub.f32 1.0, %v128_v24  ;;  %v134_v30 = vsub.f32 1.0, %v130_v25  ;;  %v145_v52 = vand.u32 2147483647, %v141_v28  ;;  %v147_v53 = vand.u32 2147483647, %v143_v31 }
  0x35   :  { %v133_v36 = vsub.f32 1.0, %v129_v32  ;;  %v135_v37 = vsub.f32 1.0, %v131_v33  ;;  %v148_v55 = vsub.f32 1.0, %v144_v50  ;;  %v150_v56 = vsub.f32 1.0, %v146_v51 }
  0x36   :  { %v136_v34 = vmax.f32 %v132_v29, 0.0  ;;  %v138_v35 = vmax.f32 %v134_v30, 0.0  ;;  %v149_v58 = vsub.f32 1.0, %v145_v52  ;;  %v151_v59 = vsub.f32 1.0, %v147_v53 }
  0x37   :  { %v137_v39 = vmax.f32 %v133_v36, 0.0  ;;  %v139_v40 = vmax.f32 %v135_v37, 0.0  ;;  %v748_v60 = vmax.f32 %v148_v55, 0.0  ;;  %v750_v61 = vmax.f32 %v150_v56, 0.0 }
  0x38   :  { %v172_v38 = vpack.c.bf16 %v138_v35, %v136_v34  ;;  %v752_v63 = vmax.f32 %v149_v58, 0.0  ;;  %v754_v1 = vmax.f32 %v151_v59, 0.0 }
  0x39   :  { %v173_v43 = vpack.c.bf16 %v139_v40, %v137_v39 }
  0x3a   :  { %246 = vmatpush.bf16.msra.mxu0 %v172_v38  ;;  %611 = vmatpush.bf16.msra.mxu2 %v172_v38 }
  0x3b   :  { %295 = vmatpush.bf16.msra.mxu1 %v173_v43  ;;  %612 = vmatpush.bf16.msra.mxu3 %v173_v43 }
  0x3d   :  { %587 = vmatmul.msk.bf16.vlgmr.msra.gmra.mxu0 %vm214_vm0, %v603_v41  ;;  %591 = vmatmul.msk.bf16.vlgmr.msra.gmra.mxu2 %vm214_vm0, %v607_v42 }
  0x3e   :  { %595 = vmatmul.msk.bf16.vlgmr.msra.gmra.mxu1 %vm214_vm0, %v603_v41  ;;  %599 = vmatmul.msk.bf16.vlgmr.msra.gmra.mxu3 %vm214_vm0, %v607_v42 }
  0x4d   :  { %588 = vmatmul.msk.bf16.gmra.mxu0 %vm214_vm0, %v604_v44  ;;  %592 = vmatmul.msk.bf16.gmra.mxu2 %vm214_vm0, %v608_v45 }
  0x4e   :  { %596 = vmatmul.msk.bf16.gmra.mxu1 %vm214_vm0, %v604_v44  ;;  %600 = vmatmul.msk.bf16.gmra.mxu3 %vm214_vm0, %v608_v45 }
  0x5d   :  { %589 = vmatmul.msk.bf16.gmra.mxu0 %vm214_vm0, %v605_v46  ;;  %593 = vmatmul.msk.bf16.gmra.mxu2 %vm214_vm0, %v609_v47 }
  0x5e   :  { %597 = vmatmul.msk.bf16.gmra.mxu1 %vm214_vm0, %v605_v46  ;;  %601 = vmatmul.msk.bf16.gmra.mxu3 %vm214_vm0, %v609_v47 }
  0x6d   :  { %590 = vmatmul.msk.bf16.gmra.mxu0 %vm214_vm0, %v606_v48  ;;  %594 = vmatmul.msk.bf16.gmra.mxu2 %vm214_vm0, %v610_v49 }
  0x6e   :  { %598 = vmatmul.msk.bf16.gmra.mxu1 %vm214_vm0, %v606_v48  ;;  %602 = vmatmul.msk.bf16.gmra.mxu3 %vm214_vm0, %v610_v49 }
  0xba   :  { %v248_v54 = vpop.f32.mrf.mxu0 }
  0xbb   :  { %v297_v57 = vpop.f32.mrf.mxu1  ;;  %v337_v4 = vmul.f32 %v248_v54, %v748_v60 }
  0xbc   :  { %v338_v7 = vmul.f32 %v297_v57, %v752_v63 }
  0xc0   :  { %v268_v62 = vpop.f32.mrf.mxu2 }
  0xc1   :  { %v317_v3 = vpop.f32.mrf.mxu3  ;;  %v353_v11 = vmul.f32 %v268_v62, %v748_v60 }
  0xc2   :  { %v250_v2 = vpop.f32.mrf.mxu0  ;;  %v354_v17 = vmul.f32 %v317_v3, %v752_v63 }
  0xc3   :  { %v339_v5 = vmul.f32 %v250_v2, %v750_v61  ;;  %v299_v6 = vpop.f32.mrf.mxu1 }
  0xc4   :  { %v340_v9 = vmul.f32 %v299_v6, %v754_v1 }
  0xc5   :  { %v369_v8 = vadd.f32 %v339_v5, %v337_v4 }
  0xc6   :  { %v376_v10 = vadd.f32 %v340_v9, %v338_v7 }
  0xc7   :  { %v370_v16 = vrot.slane %v369_v8, 4 }
  0xc8   :  { %v270_v0 = vpop.f32.mrf.mxu2  ;;  %v377_v20 = vrot.slane %v376_v10, 4 }
  0xc9   :  { %v355_v12 = vmul.f32 %v270_v0, %v750_v61  ;;  %v319_v14 = vpop.f32.mrf.mxu3  ;;  %v371_v22 = vadd.f32 %v370_v16, %v369_v8 }
  0xca   :  { %v253_v13 = vpop.f32.mrf.mxu0  ;;  %v356_v18 = vmul.f32 %v319_v14, %v754_v1  ;;  %v378_v24 = vadd.f32 %v377_v20, %v376_v10 }
  0xcb   :  { %v762_v15 = vadd.f32 %v355_v12, %v353_v11  ;;  %v302_v19 = vpop.f32.mrf.mxu1  ;;  %v341_v27 = vmul.f32 %v253_v13, %v748_v60  ;;  %v372_v29 = vrot.slane %v371_v22, 2 }
  0xcc   :  { %v766_v21 = vadd.f32 %v356_v18, %v354_v17  ;;  %v342_v31 = vmul.f32 %v302_v19, %v752_v63  ;;  %v379_v34 = vrot.slane %v378_v24, 2 }
  0xcd   :  { %v373_v37 = vadd.f32 %v372_v29, %v371_v22  ;;  %v426_v18 = vrot.slane %v762_v15, 4 }
  0xce   :  { %v380_v43 = vadd.f32 %v379_v34, %v378_v24 }
  0xcf   :  { %v374_v52 = vrot.slane %v373_v37, 1 }
  0xd0   :  { %v273_v23 = vpop.f32.mrf.mxu2  ;;  %v381_v55 = vrot.slane %v380_v43, 1 }
  0xd1   :  { %v322_v26 = vpop.f32.mrf.mxu3  ;;  %v357_v39 = vmul.f32 %v273_v23, %v748_v60  ;;  %v375_v62 = vadd.f32 %v374_v52, %v373_v37 }
  0xd2   :  { %v255_v25 = vpop.f32.mrf.mxu0  ;;  %v358_v49 = vmul.f32 %v322_v26, %v752_v63  ;;  %v382_v4 = vadd.f32 %v381_v55, %v380_v43 }
  0xd3   :  { %v343_v28 = vmul.f32 %v255_v25, %v750_v61  ;;  %v304_v30 = vpop.f32.mrf.mxu1 }
  0xd4   :  { %v344_v33 = vmul.f32 %v304_v30, %v754_v1  ;;  %v427_v30 = vadd.f32 %v426_v18, %v762_v15 }
  0xd5   :  { %v383_v32 = vadd.f32 %v343_v28, %v341_v27 }
  0xd6   :  { %v390_v36 = vadd.f32 %v344_v33, %v342_v31 }
  0xd7   :  { %v384_v35 = vrot.slane %v383_v32, 4 }
  0xd8   :  { %v275_v38 = vpop.f32.mrf.mxu2  ;;  %v391_v41 = vrot.slane %v390_v36, 4 }
  0xd9   :  { %v385_v40 = vadd.f32 %v384_v35, %v383_v32  ;;  %v359_v42 = vmul.f32 %v275_v38, %v750_v61  ;;  %v324_v45 = vpop.f32.mrf.mxu3 }
  0xda   :  { %v258_v44 = vpop.f32.mrf.mxu0  ;;  %v392_v47 = vadd.f32 %v391_v41, %v390_v36  ;;  %v360_v50 = vmul.f32 %v324_v45, %v754_v1  ;;  %v433_v36 = vrot.slane %v766_v21, 4  ;;  %v428_v41 = vrot.slane %v427_v30, 2 }
  0xdb   :  { %v386_v46 = vrot.slane %v385_v40, 2  ;;  %v439_v48 = vadd.f32 %v359_v42, %v357_v39  ;;  %v307_v51 = vpop.f32.mrf.mxu1  ;;  %v345_v9 = vmul.f32 %v258_v44, %v748_v60 }
  0xdc   :  { %v393_v54 = vrot.slane %v392_v47, 2  ;;  %v446_v56 = vadd.f32 %v360_v50, %v358_v49  ;;  %v346_v12 = vmul.f32 %v307_v51, %v752_v63 }
  0xdd   :  { %v387_v53 = vadd.f32 %v386_v46, %v385_v40  ;;  %v440_v37 = vrot.slane %v439_v48, 4  ;;  %v434_v46 = vadd.f32 %v433_v36, %v766_v21 }
  0xde   :  { %v394_v58 = vadd.f32 %v393_v54, %v392_v47  ;;  %v447_v42 = vrot.slane %v446_v56, 4 }
  0xdf   :  { %v388_v57 = vrot.slane %v387_v53, 1  ;;  %v441_v47 = vadd.f32 %v440_v37, %v439_v48 }
  0xe0   :  { %v278_v59 = vpop.f32.mrf.mxu2  ;;  %v395_v3 = vrot.slane %v394_v58, 1 }
  0xe1   :  { %v389_v2 = vadd.f32 %v388_v57, %v387_v53  ;;  %v327_v6 = vpop.f32.mrf.mxu3  ;;  %v361_v20 = vmul.f32 %v278_v59, %v748_v60  ;;  %v429_v57 = vadd.f32 %v428_v41, %v427_v30 }
  0xe2   :  { %v260_v5 = vpop.f32.mrf.mxu0  ;;  %v396_v8 = vadd.f32 %v395_v3, %v394_v58  ;;  %v362_v31 = vmul.f32 %v327_v6, %v752_v63  ;;  %v448_v58 = vadd.f32 %v447_v42, %v446_v56 }
  0xe3   :  { %v498_v7 = vsel %vm497_vm1, %v389_v2, %v375_v62  ;;  %v347_v10 = vmul.f32 %v260_v5, %v750_v61  ;;  %v309_v0 = vpop.f32.mrf.mxu1  ;;  %v442_v5 = vrot.slane %v441_v47, 2 }
  0xe4   :  { %v511_v11 = vsel %vm497_vm1, %v396_v8, %v382_v4  ;;  %v348_v14 = vmul.f32 %v309_v0, %v754_v1  ;;  %v435_v4 = vrot.slane %v434_v46, 2 }
  0xe5   :  { %v397_v13 = vadd.f32 %v347_v10, %v345_v9  ;;  %v430_v9 = vrot.slane %v429_v57, 1  ;;  %v449_v10 = vrot.slane %v448_v58, 2 }
  0xe6   :  { %v404_v17 = vadd.f32 %v348_v14, %v346_v12 }
  0xe7   :  { %v398_v16 = vrot.slane %v397_v13, 4 }
  0xe8   :  { %v280_v19 = vpop.f32.mrf.mxu2  ;;  %v405_v23 = vrot.slane %v404_v17, 4 }
  0xe9   :  { %v399_v22 = vadd.f32 %v398_v16, %v397_v13  ;;  %v363_v24 = vmul.f32 %v280_v19, %v750_v61  ;;  %v329_v26 = vpop.f32.mrf.mxu3  ;;  %v436_v16 = vadd.f32 %v435_v4, %v434_v46 }
  0xea   :  { %v263_v25 = vpop.f32.mrf.mxu0  ;;  %v406_v28 = vadd.f32 %v405_v23, %v404_v17  ;;  %v364_v32 = vmul.f32 %v329_v26, %v754_v1  ;;  %v443_v17 = vadd.f32 %v442_v5, %v441_v47  ;;  %v450_v26 = vadd.f32 %v449_v10, %v448_v58 }
  0xeb   :  { %v400_v27 = vrot.slane %v399_v22, 2  ;;  %v453_v29 = vadd.f32 %v363_v24, %v361_v20  ;;  %v312_v33 = vpop.f32.mrf.mxu1  ;;  %v349_v54 = vmul.f32 %v263_v25, %v748_v60 }
  0xec   :  { %v407_v35 = vrot.slane %v406_v28, 2  ;;  %v460_v38 = vadd.f32 %v364_v32, %v362_v31  ;;  %v350_v21 = vmul.f32 %v312_v33, %v752_v63  ;;  %v431_v31 = vadd.f32 %v430_v9, %v429_v57 }
  0xed   :  { %v401_v34 = vadd.f32 %v400_v27, %v399_v22  ;;  %v454_v43 = vrot.slane %v453_v29, 4  ;;  %v437_v32 = vrot.slane %v436_v16, 1  ;;  %v451_v37 = vrot.slane %v450_v26, 1 }
  0xee   :  { %v408_v40 = vadd.f32 %v407_v35, %v406_v28  ;;  %v461_v49 = vrot.slane %v460_v38, 4 }
  0xef   :  { %v402_v39 = vrot.slane %v401_v34, 1  ;;  %v455_v59 = vadd.f32 %v454_v43, %v453_v29  ;;  %v438_v47 = vadd.f32 %v437_v32, %v436_v16 }
  0xf0   :  { %v283_v44 = vpop.f32.mrf.mxu2  ;;  %v409_v15 = vrot.slane %v408_v40, 1  ;;  %v462_v6 = vadd.f32 %v461_v49, %v460_v38  ;;  %v452_v49 = vadd.f32 %v451_v37, %v450_v26 }
  0xf1   :  { %v403_v45 = vadd.f32 %v402_v39, %v401_v34  ;;  %v332_v51 = vpop.f32.mrf.mxu3  ;;  %v456_v0 = vrot.slane %v455_v59, 2  ;;  %v365_v56 = vmul.f32 %v283_v44, %v748_v60 }
  0xf2   :  { %v265_v50 = vpop.f32.mrf.mxu0  ;;  %v410_v53 = vadd.f32 %v409_v15, %v408_v40  ;;  %v463_v18 = vrot.slane %v462_v6, 2  ;;  %v366_v19 = vmul.f32 %v332_v51, %v752_v63 }
  0xf3   :  { %v789_v52 = vsel %vm499_vm2, %v403_v45, %v498_v7  ;;  %v351_v55 = vmul.f32 %v265_v50, %v750_v61  ;;  %v314_v62 = vpop.f32.mrf.mxu1  ;;  %v457_v27 = vadd.f32 %v456_v0, %v455_v59 }
  0xf4   :  { %v794_v2 = vsel %vm499_vm2, %v410_v53, %v511_v11  ;;  %v352_v3 = vmul.f32 %v314_v62, %v754_v1  ;;  %v464_v33 = vadd.f32 %v463_v18, %v462_v6 }
  0xf5   :  { %v411_v48 = vadd.f32 %v351_v55, %v349_v54  ;;  %v458_v38 = vrot.slane %v457_v27, 1 }
  0xf6   :  { %v418_v8 = vadd.f32 %v352_v3, %v350_v21  ;;  %v465_v43 = vrot.slane %v464_v33, 1 }
  0xf7   :  { %v412_v7 = vrot.slane %v411_v48, 4  ;;  %v459_v50 = vadd.f32 %v458_v38, %v457_v27 }
  0xf8   :  { %v285_v12 = vpop.f32.mrf.mxu2  ;;  %v419_v14 = vrot.slane %v418_v8, 4  ;;  %v466_v58 = vadd.f32 %v465_v43, %v464_v33 }
  0xf9   :  { %v413_v13 = vadd.f32 %v412_v7, %v411_v48  ;;  %v367_v11 = vmul.f32 %v285_v12, %v750_v61  ;;  %v334_v20 = vpop.f32.mrf.mxu3  ;;  %v444_v61 = vrot.slane %v443_v17, 1 }
  0xfa   :  { %v420_v23 = vadd.f32 %v419_v14, %v418_v8  ;;  %v368_v25 = vmul.f32 %v334_v20, %v754_v1 }
  0xfb   :  { %v414_v22 = vrot.slane %v413_v13, 2  ;;  %v467_v24 = vadd.f32 %v367_v11, %v365_v56  ;;  %v445_v42 = vadd.f32 %v444_v61, %v443_v17 }
  0xfc   :  { %v421_v29 = vrot.slane %v420_v23, 2  ;;  %v474_v30 = vadd.f32 %v368_v25, %v366_v19 }
  0xfd   :  { %v415_v28 = vadd.f32 %v414_v22, %v413_v13  ;;  %v468_v60 = vrot.slane %v467_v24, 4 }
  0xfe   :  { %v422_v35 = vadd.f32 %v421_v29, %v420_v23  ;;  %v475_v63 = vrot.slane %v474_v30, 4 }
  0xff   :  { %v416_v34 = vrot.slane %v415_v28, 1  ;;  %v469_v36 = vadd.f32 %v468_v60, %v467_v24 }
 0x100   :  { %v423_v1 = vrot.slane %v422_v35, 1  ;;  %v476_v41 = vadd.f32 %v475_v63, %v474_v30 }
 0x101   :  { %v417_v39 = vadd.f32 %v416_v34, %v415_v28  ;;  %v470_v40 = vrot.slane %v469_v36, 2 }
 0x102   :  { %v424_v44 = vadd.f32 %v423_v1, %v422_v35  ;;  %v477_v15 = vrot.slane %v476_v41, 2 }
 0x103   :  { %v471_v45 = vadd.f32 %v470_v40, %v469_v36  ;;  %v502_v46 = vsel %vm501_vm3, %v417_v39, %v789_v52 }
 0x104   :  { %v504_v51 = vsel %vm503_vm4, %v431_v31, %v502_v46  ;;  %v478_v54 = vadd.f32 %v477_v15, %v476_v41  ;;  %v513_v57 = vsel %vm501_vm3, %v424_v44, %v794_v2 }
 0x105   :  { %v472_v53 = vrot.slane %v471_v45, 1  ;;  %v506_v55 = vsel %vm505_vm5, %v445_v42, %v504_v51  ;;  %v514_v62 = vsel %vm503_vm4, %v438_v47, %v513_v57 }
 0x106   :  { %v508_v59 = vsel %vm507_vm6, %v459_v50, %v506_v55  ;;  %v479_v21 = vrot.slane %v478_v54, 1  ;;  %v515_v48 = vsel %vm505_vm5, %v452_v49, %v514_v62 }
 0x107   :  { %v473_v52 = vadd.f32 %v472_v53, %v471_v45  ;;  %v516_v3 = vsel %vm507_vm6, %v466_v58, %v515_v48 }
 0x108   :  { %v480_v4 = vadd.f32 %v479_v21, %v478_v54 }
 0x109   :  { %v510_v2 = vsel %vm509_vm7, %v473_v52, %v508_v59 }
 0x10a   :  { %520 = vst [vmem:[#allocation5] sm:$0xff] %v510_v2  ;;  %v517_v5 = vsel %vm509_vm7, %v480_v4, %v516_v3 }
 0x10b   :  { %521 = vst [vmem:[#allocation5 + $0x8] sm:$0xff] %v517_v5 }
 0x10c   :  { %532 = dma.vmem_to_hbm [thread:$0]  %s528_s9, 256, %s530_s12, [#allocation3]  }
 0x10d   :  { %657 = dma.done.wait [#allocation3], 256  }
 0x10e   :  { %658 = vsyncadd [#allocation3], 4294967040 }
 0x10f   :  { %537 = vsyncpa [#allocation3], 1 }
 0x110   :  { %538 = vsyncpa [#allocation4], 1 }

</bundles_post_ra>
